<compile_context>
chip_gen: v7x
topology: tpu7x:2x2x1
jax: 0.10.0
libtpu: 0.0.40
codegen_flags: <defaults>
</compile_context>

<pallas_src>
import functools
import math

import jax
import jax.numpy as jnp
import numpy as np
from jax.experimental import pallas as pl
from jax.experimental.pallas import tpu as pltpu

BN_EPS = 1e-5
LANE = 128
# v7x has 64 MiB physical VMEM per TensorCore -> stay well under it, everywhere.
_VMEM_LIMIT_BYTES = 48 * 1024 * 1024
_TILE_VMEM_BUDGET = 12 * 1024 * 1024


# ------------------------------ small helpers ------------------------------ #
def _round_up(x, m):
    return ((x + m - 1) // m) * m


def _largest_divisor_leq(n, cap):
    cap = max(1, min(n, cap))
    for d in range(cap, 0, -1):
        if n % d == 0:
            return d
    return 1


def _pick_batch_tile(N, Lp, L, cin_p, co_p, mm_bytes):
    # Rough per-sample VMEM working set: double-buffered input tile, padded conv2
    # scratch, plus f32 accumulator/output tiles (also double-buffered).
    per_sample = (2 * Lp * cin_p * mm_bytes
                  + Lp * co_p * mm_bytes
                  + 3 * 2 * L * co_p * 4)
    cap = max(1, _TILE_VMEM_BUDGET // max(per_sample, 1))
    if N >= 2:
        cap = min(cap, max(1, N // 2))   # keep >=2 grid steps so v7x cores both work
    return _largest_divisor_leq(N, cap)


def _bytes_of(*arrs):
    return sum(int(math.prod(a.shape)) * jnp.dtype(a.dtype).itemsize for a in arrs)


# ------------------------------ kernel bodies ------------------------------ #
def _conv_taps_matmul(src_ref, w_ref, b_row, *, L, K, mm_dtype):
    """sum_k src[:, k:k+L, :] @ w[k], with (batch, length) flattened into the MXU M dim."""
    bn = src_ref.shape[0]
    acc = None
    for k in range(K):
        xk = src_ref[:, k:k + L, :].astype(mm_dtype)
        xk = xk.reshape(bn * L, xk.shape[-1])
        yk = jnp.dot(xk, w_ref[k], preferred_element_type=jnp.float32)
        acc = yk if acc is None else acc + yk            # single f32 accumulator
    return acc + b_row                                    # (bn*L, Co_p) f32


def _stage1_kernel(*refs, L, K, pad, identity, mm_dtype):
    # conv1 (+ optional 1x1 downsample conv) and per-tile BN partial statistics.
    if identity:
        (xpad_ref, w1_ref, b1_ref, y1_ref, st_ref) = refs
    else:
        (xpad_ref, w1_ref, b1_ref, wd_ref, bd_ref, y1_ref, yd_ref, st_ref) = refs

    bn = xpad_ref.shape[0]
    co = y1_ref.shape[-1]

    y1 = _conv_taps_matmul(xpad_ref, w1_ref, b1_ref[...], L=L, K=K, mm_dtype=mm_dtype)
    y1_ref[...] = y1.reshape(bn, L, co).astype(y1_ref.dtype)

    rows = [jnp.sum(y1, axis=0, keepdims=True),
            jnp.sum(y1 * y1, axis=0, keepdims=True)]

    if not identity:
        xc = xpad_ref[:, pad:pad + L, :].astype(mm_dtype).reshape(bn * L, -1)
        yd = jnp.dot(xc, wd_ref[...], preferred_element_type=jnp.float32) + bd_ref[...]
        yd_ref[...] = yd.reshape(bn, L, co).astype(yd_ref.dtype)
        rows += [jnp.sum(yd, axis=0, keepdims=True),
                 jnp.sum(yd * yd, axis=0, keepdims=True)]

    st_ref[0] = jnp.concatenate(rows, axis=0)


def _stage2_kernel(y1_ref, sc1_ref, sh1_ref, w2_ref, b2_ref,
                   y2_ref, st_ref, hpad_ref, *, L, K, pad, mm_dtype):
    # bn1(affine) -> relu -> conv2, plus per-tile BN partial statistics for bn2.
    bn = y1_ref.shape[0]
    co = y1_ref.shape[-1]

    h = jnp.maximum(y1_ref[...].astype(jnp.float32) * sc1_ref[...] + sh1_ref[...], 0.0)

    # Padded activation in a persistent VMEM scratch: zero only the boundary rows,
    # write the interior once (no jnp.concatenate copy of the full activation).
    if pad > 0:
        hpad_ref[:, 0:pad, :] = jnp.zeros((bn, pad, co), dtype=hpad_ref.dtype)
        hpad_ref[:, pad + L:pad + L + pad, :] = jnp.zeros((bn, pad, co), dtype=hpad_ref.dtype)
    hpad_ref[:, pad:pad + L, :] = h.astype(hpad_ref.dtype)

    y2 = _conv_taps_matmul(hpad_ref, w2_ref, b2_ref[...], L=L, K=K, mm_dtype=mm_dtype)
    y2_ref[...] = y2.reshape(bn, L, co).astype(y2_ref.dtype)
    st_ref[0] = jnp.concatenate(
        [jnp.sum(y2, axis=0, keepdims=True),
         jnp.sum(y2 * y2, axis=0, keepdims=True)], axis=0)


def _stage3_kernel(*refs, L, identity, maxpool):
    # bn2(affine) + residual (identity or bnD(affine) of the 1x1 conv) + relu [+ maxpool].
    if identity:
        (y2_ref, res_ref, sc2_ref, sh2_ref, o_ref) = refs
        residual = res_ref[...].astype(jnp.float32)
    else:
        (y2_ref, yd_ref, sc2_ref, sh2_ref, scd_ref, shd_ref, o_ref) = refs
        residual = yd_ref[...].astype(jnp.float32) * scd_ref[...] + shd_ref[...]

    out = y2_ref[...].astype(jnp.float32) * sc2_ref[...] + sh2_ref[...] + residual
    out = jnp.maximum(out, 0.0)

    if maxpool:
        bn, _, co = out.shape
        l2 = L // 2
        out = out[:, :2 * l2, :].reshape(bn, l2, 2, co)
        out = jnp.max(out, axis=2)

    o_ref[...] = out.astype(o_ref.dtype)


# --------------------------------- wrapper ---------------------------------- #
def residual_block(x_ncl, params, *, kernel_size=3, stride=1, padding=1,
                   dilation=1, maxpool=False, mm_dtype=jnp.float32):
    if stride != 1 or dilation != 1:
        raise NotImplementedError("only stride=1, dilation=1 supported")
    if 2 * padding != (kernel_size - 1):
        raise NotImplementedError("only 'same'-length convolutions supported")

    N, Cin, L = x_ncl.shape
    K = kernel_size
    Co = params["w1"].shape[0]
    identity = (Cin == Co)
    Lout = (L // 2) if maxpool else L

    cin_p = _round_up(max(Cin, 1), LANE)
    co_p = _round_up(max(Co, 1), LANE)
    Lp = L + 2 * padding
    mm_bytes = jnp.dtype(mm_dtype).itemsize

    # ---- lane-dense, channels-last operands -------------------------------- #
    x_nlc = jnp.transpose(x_ncl, (0, 2, 1)).astype(jnp.float32)
    x_nlc = jnp.pad(x_nlc, ((0, 0), (0, 0), (0, cin_p - Cin))).astype(mm_dtype)
    xpad = jnp.pad(x_nlc, ((0, 0), (padding, padding), (0, 0)))

    def conv_w(w, ci_p):                 # (Co, Ci, K) -> (K, ci_p, co_p)
        wk = jnp.transpose(w, (2, 1, 0)).astype(jnp.float32)
        wk = jnp.pad(wk, ((0, 0), (0, ci_p - wk.shape[1]), (0, co_p - wk.shape[2])))
        return wk.astype(mm_dtype)

    def row_f32(v):                      # (Co,) -> (1, co_p) f32
        return jnp.pad(v.astype(jnp.float32), (0, co_p - v.shape[0])).reshape(1, co_p)

    def chan_f32(v):                     # (Co,) -> (co_p,) f32
        return jnp.pad(v.astype(jnp.float32), (0, co_p - v.shape[0]))

    w1 = conv_w(params["w1"], cin_p)
    b1 = row_f32(params["b1"])
    w2 = conv_w(params["w2"], co_p)
    b2 = row_f32(params["b2"])
    g1, bt1 = chan_f32(params["g1"]), chan_f32(params["bt1"])
    g2, bt2 = chan_f32(params["g2"]), chan_f32(params["bt2"])
    if not identity:
        wd = params["wd"][:, :, 0].T.astype(jnp.float32)            # (Cin, Co)
        wd = jnp.pad(wd, ((0, cin_p - Cin), (0, co_p - Co))).astype(mm_dtype)
        bd = row_f32(params["bd"])
        gd, btd = chan_f32(params["gd"]), chan_f32(params["btd"])

    # ---- grid over batch tiles --------------------------------------------- #
    bn = _pick_batch_tile(N, Lp, L, cin_p, co_p, mm_bytes)
    nt = N // bn
    count = float(N * L)

    cparams = pltpu.CompilerParams(
        dimension_semantics=("parallel",),           # megacore sharding on v7x
        vmem_limit_bytes=_VMEM_LIMIT_BYTES)

    def tileN(shape):
        return pl.BlockSpec(shape, lambda i: (i, 0, 0))

    def full3(shape):
        return pl.BlockSpec(shape, lambda i: (0, 0, 0))

    def full2(shape):
        return pl.BlockSpec(shape, lambda i: (0, 0))

    # ---------------------------- pass 1: conv1 / conv_down + partial stats --- #
    n_stat1 = 2 if identity else 4
    in1 = [xpad, w1, b1]
    in1_specs = [tileN((bn, Lp, cin_p)), full3((K, cin_p, co_p)), full2((1, co_p))]
    out1_shapes = [jax.ShapeDtypeStruct((N, L, co_p), mm_dtype)]
    out1_specs = [tileN((bn, L, co_p))]
    if not identity:
        in1 += [wd, bd]
        in1_specs += [full2((cin_p, co_p)), full2((1, co_p))]
        out1_shapes += [jax.ShapeDtypeStruct((N, L, co_p), mm_dtype)]
        out1_specs += [tileN((bn, L, co_p))]
    out1_shapes += [jax.ShapeDtypeStruct((nt, n_stat1, co_p), jnp.float32)]
    out1_specs += [pl.BlockSpec((1, n_stat1, co_p), lambda i: (i, 0, 0))]

    flops1 = 2 * N * L * cin_p * co_p * (K + (0 if identity else 1))
    res1 = pl.pallas_call(
        functools.partial(_stage1_kernel, L=L, K=K, pad=padding,
                          identity=identity, mm_dtype=mm_dtype),
        grid=(nt,),
        in_specs=in1_specs,
        out_specs=tuple(out1_specs),
        out_shape=tuple(out1_shapes),
        compiler_params=cparams,
        cost_estimate=pl.CostEstimate(flops=int(flops1), transcendentals=0,
                                      bytes_accessed=_bytes_of(xpad, w1, *out1_shapes)),
    )(*in1)
    if identity:
        y1, st1 = res1
    else:
        y1, yd, st1 = res1

    # ---- fold per-tile partials into per-channel BN affine (tiny, in XLA) ---- #
    def bn_affine(stat_rows, gamma, beta):
        s = jnp.sum(stat_rows[:, 0, :], axis=0)
        ss = jnp.sum(stat_rows[:, 1, :], axis=0)
        mean = s / count
        # one-pass variance; clamp guards E[x^2]-E[x]^2 cancellation in f32
        var = jnp.maximum(ss / count - mean * mean, 0.0)
        scale = gamma * jax.lax.rsqrt(var + BN_EPS)
        shift = beta - mean * scale
        return scale.reshape(1, co_p), shift.reshape(1, co_p)

    sc1, sh1 = bn_affine(st1[:, 0:2, :], g1, bt1)
    if not identity:
        scd, shd = bn_affine(st1[:, 2:4, :], gd, btd)

    # ---------------------------- pass 2: bn1 -> relu -> conv2 + partial stats - #
    flops2 = 2 * N * L * co_p * co_p * K
    y2, st2 = pl.pallas_call(
        functools.partial(_stage2_kernel, L=L, K=K, pad=padding, mm_dtype=mm_dtype),
        grid=(nt,),
        in_specs=[tileN((bn, L, co_p)), full2((1, co_p)), full2((1, co_p)),
                  full3((K, co_p, co_p)), full2((1, co_p))],
        out_specs=(tileN((bn, L, co_p)),
                   pl.BlockSpec((1, 2, co_p), lambda i: (i, 0, 0))),
        out_shape=(jax.ShapeDtypeStruct((N, L, co_p), mm_dtype),
                   jax.ShapeDtypeStruct((nt, 2, co_p), jnp.float32)),
        scratch_shapes=[pltpu.VMEM((bn, Lp, co_p), mm_dtype)],
        compiler_params=cparams,
        cost_estimate=pl.CostEstimate(flops=int(flops2), transcendentals=0,
                                      bytes_accessed=_bytes_of(y1, w2) * 2),
    )(y1, sc1, sh1, w2, b2)

    sc2, sh2 = bn_affine(st2, g2, bt2)

    # ---------------------------- pass 3: bn2 + residual + relu [+ maxpool] ---- #
    in3 = [y2]
    in3_specs = [tileN((bn, L, co_p))]
    if identity:
        in3 += [x_nlc, sc2, sh2]
        in3_specs += [tileN((bn, L, cin_p)), full2((1, co_p)), full2((1, co_p))]
    else:
        in3 += [yd, sc2, sh2, scd, shd]
        in3_specs += [tileN((bn, L, co_p)), full2((1, co_p)), full2((1, co_p)),
                      full2((1, co_p)), full2((1, co_p))]

    out_nlc = pl.pallas_call(
        functools.partial(_stage3_kernel, L=L, identity=identity, maxpool=maxpool),
        grid=(nt,),
        in_specs=in3_specs,
        out_specs=pl.BlockSpec((bn, Lout, co_p), lambda i: (i, 0, 0)),
        out_shape=jax.ShapeDtypeStruct((N, Lout, co_p), jnp.float32),
        compiler_params=cparams,
        cost_estimate=pl.CostEstimate(flops=int(6 * N * L * co_p), transcendentals=0,
                                      bytes_accessed=int(3 * N * L * co_p * 4)),
    )(*in3)

    return jnp.transpose(out_nlc[:, :, :Co], (0, 2, 1))     # back to NCL, drop pad chans


# ----------------------------- pure-JAX reference --------------------------- #
def _bn_ref_ncl(h, g, b):
    mean = h.mean(axis=(0, 2), keepdims=True)
    var = ((h - mean) ** 2).mean(axis=(0, 2), keepdims=True)
    return (h - mean) / jnp.sqrt(var + BN_EPS) * g[None, :, None] + b[None, :, None]


def _conv_ref_ncl(x, w, b, pad):
    y = jax.lax.conv_general_dilated(x, w, window_strides=(1,), padding=[(pad, pad)],
                                     dimension_numbers=("NCH", "OIH", "NCH"))
    return y + b[None, :, None]


def residual_block_ref(x, p, padding=1, maxpool=False):
    Cin, Co = x.shape[1], p["w1"].shape[0]
    if Cin == Co:
        residual = x
    else:
        residual = _bn_ref_ncl(_conv_ref_ncl(x, p["wd"], p["bd"], 0), p["gd"], p["btd"])
    out = jax.nn.relu(_bn_ref_ncl(_conv_ref_ncl(x, p["w1"], p["b1"], padding), p["g1"], p["bt1"]))
    out = _bn_ref_ncl(_conv_ref_ncl(out, p["w2"], p["b2"], padding), p["g2"], p["bt2"])
    out = jax.nn.relu(out + residual)
    if maxpool:
        out = jnp.maximum(out[:, :, 0::2], out[:, :, 1::2])
    return out


def _make_params(key, cin, co, k, with_downsample):
    keys = jax.random.split(key, 12)
    p = {
        "w1": 0.2 * jax.random.normal(keys[0], (co, cin, k), jnp.float32),
        "b1": 0.1 * jax.random.normal(keys[1], (co,), jnp.float32),
        "g1": 1.0 + 0.1 * jax.random.normal(keys[2], (co,), jnp.float32),
        "bt1": 0.1 * jax.random.normal(keys[3], (co,), jnp.float32),
        "w2": 0.2 * jax.random.normal(keys[4], (co, co, k), jnp.float32),
        "b2": 0.1 * jax.random.normal(keys[5], (co,), jnp.float32),
        "g2": 1.0 + 0.1 * jax.random.normal(keys[6], (co,), jnp.float32),
        "bt2": 0.1 * jax.random.normal(keys[7], (co,), jnp.float32),
    }
    if with_downsample:
        p.update({
            "wd": 0.2 * jax.random.normal(keys[8], (co, cin, 1), jnp.float32),
            "bd": 0.1 * jax.random.normal(keys[9], (co,), jnp.float32),
            "gd": 1.0 + 0.1 * jax.random.normal(keys[10], (co,), jnp.float32),
            "btd": 0.1 * jax.random.normal(keys[11], (co,), jnp.float32),
        })
    return p


# ----------------------------------- main ------------------------------------ #
if __name__ == "__main__":
    root = jax.random.PRNGKey(0)
    k1, k2, k3, k4 = jax.random.split(root, 4)

    # Case 1: in_channels != out_channels (conv+BN downsample path), no maxpool.
    N, Cin, Co, L, K = 2, 4, 8, 16, 3
    p1 = _make_params(k1, Cin, Co, K, with_downsample=True)
    x1 = jax.random.normal(k2, (N, Cin, L), jnp.float32)
    out1 = jax.block_until_ready(
        residual_block(x1, p1, kernel_size=K, padding=1, maxpool=False, mm_dtype=jnp.float32))
    ref1 = jax.block_until_ready(residual_block_ref(x1, p1, padding=1, maxpool=False))
    assert out1.shape == (N, Co, L)
    np.testing.assert_allclose(np.asarray(out1), np.asarray(ref1), rtol=1e-4, atol=1e-4)

    # Case 2: identity residual + MaxPool1d(kernel_size=2).
    Ci2 = 8
    p2 = _make_params(k3, Ci2, Ci2, K, with_downsample=False)
    x2 = jax.random.normal(k4, (N, Ci2, L), jnp.float32)
    out2 = jax.block_until_ready(
        residual_block(x2, p2, kernel_size=K, padding=1, maxpool=True, mm_dtype=jnp.float32))
    ref2 = jax.block_until_ready(residual_block_ref(x2, p2, padding=1, maxpool=True))
    assert out2.shape == (N, Ci2, L // 2)
    np.testing.assert_allclose(np.asarray(out2), np.asarray(ref2), rtol=1e-4, atol=1e-4)

    # Case 3: bf16 MXU operands (v6e/v7x fast path) with f32 accumulation + f32 BN stats.
    out3 = jax.block_until_ready(
        residual_block(x1, p1, kernel_size=K, padding=1, maxpool=False, mm_dtype=jnp.bfloat16))
    np.testing.assert_allclose(np.asarray(out3), np.asarray(ref1), rtol=5e-2, atol=5e-2)

    print("KERNEL_OK")
</pallas_src>

<mosaic_0001>
module attributes {stable_mosaic.version = 11 : i64} {
  func.func @_stage1_kernel(%arg0: i32, %arg1: memref<1x18x128xf32, #tpu.memory_space<vmem>>, %arg2: memref<3x128x128xf32, #tpu.memory_space<vmem>>, %arg3: memref<1x128xf32, #tpu.memory_space<vmem>>, %arg4: memref<128x128xf32, #tpu.memory_space<vmem>>, %arg5: memref<1x128xf32, #tpu.memory_space<vmem>>, %arg6: memref<1x16x128xf32, #tpu.memory_space<vmem>>, %arg7: memref<1x16x128xf32, #tpu.memory_space<vmem>>, %arg8: memref<1x4x128xf32, #tpu.memory_space<vmem>>) attributes {dimension_semantics = [#tpu.dimension_semantics<parallel>], iteration_bounds = array<i64: 2>, scalar_prefetch = 0 : i64, scratch_operands = 0 : i64, tpu.core_type = #tpu.core_type<tc>, window_params = [{transform_indices = @transform_0, window_bounds = array<i64: 1, 18, 128>}, {pipeline_mode = #tpu.pipeline_mode<synchronous>, transform_indices = @transform_1, window_bounds = array<i64: 3, 128, 128>}, {pipeline_mode = #tpu.pipeline_mode<synchronous>, transform_indices = @transform_2, window_bounds = array<i64: 1, 128>}, {pipeline_mode = #tpu.pipeline_mode<synchronous>, transform_indices = @transform_3, window_bounds = array<i64: 128, 128>}, {pipeline_mode = #tpu.pipeline_mode<synchronous>, transform_indices = @transform_4, window_bounds = array<i64: 1, 128>}, {transform_indices = @transform_5, window_bounds = array<i64: 1, 16, 128>}, {transform_indices = @transform_6, window_bounds = array<i64: 1, 16, 128>}, {transform_indices = @transform_7, window_bounds = array<i64: 1, 4, 128>}]} {
    %c0 = arith.constant 0 : index
    %c0_0 = arith.constant 0 : index
    %0 = vector.load %arg3[%c0, %c0_0] : memref<1x128xf32, #tpu.memory_space<vmem>>, vector<1x128xf32>
    %c0_1 = arith.constant 0 : index
    %c0_2 = arith.constant 0 : index
    %c0_3 = arith.constant 0 : index
    %1 = vector.load %arg1[%c0_1, %c0_2, %c0_3] : memref<1x18x128xf32, #tpu.memory_space<vmem>>, vector<1x16x128xf32>
    %2 = vector.shape_cast %1 : vector<1x16x128xf32> to vector<16x128xf32>
    %c0_4 = arith.constant 0 : index
    %c0_5 = arith.constant 0 : index
    %c0_6 = arith.constant 0 : index
    %3 = vector.load %arg2[%c0_4, %c0_5, %c0_6] : memref<3x128x128xf32, #tpu.memory_space<vmem>>, vector<1x128x128xf32>
    %4 = vector.shape_cast %3 : vector<1x128x128xf32> to vector<128x128xf32>
    %cst = arith.constant dense<0.000000e+00> : vector<16x128xf32>
    %5 = tpu.matmul %2, %4, %cst {dimension_numbers = #tpu.dot_dimension_numbers<[1], [0], [0], [1], [0, 0, 1, 1], [], []>} : vector<16x128xf32>, vector<128x128xf32>, vector<16x128xf32> -> vector<16x128xf32>
    %c0_7 = arith.constant 0 : index
    %c1 = arith.constant 1 : index
    %c0_8 = arith.constant 0 : index
    %6 = vector.load %arg1[%c0_7, %c1, %c0_8] : memref<1x18x128xf32, #tpu.memory_space<vmem>>, vector<1x16x128xf32>
    %7 = vector.shape_cast %6 : vector<1x16x128xf32> to vector<16x128xf32>
    %c1_9 = arith.constant 1 : index
    %c0_10 = arith.constant 0 : index
    %c0_11 = arith.constant 0 : index
    %8 = vector.load %arg2[%c1_9, %c0_10, %c0_11] : memref<3x128x128xf32, #tpu.memory_space<vmem>>, vector<1x128x128xf32>
    %9 = vector.shape_cast %8 : vector<1x128x128xf32> to vector<128x128xf32>
    %cst_12 = arith.constant dense<0.000000e+00> : vector<16x128xf32>
    %10 = tpu.matmul %7, %9, %cst_12 {dimension_numbers = #tpu.dot_dimension_numbers<[1], [0], [0], [1], [0, 0, 1, 1], [], []>} : vector<16x128xf32>, vector<128x128xf32>, vector<16x128xf32> -> vector<16x128xf32>
    %11 = arith.addf %5, %10 : vector<16x128xf32>
    %c0_13 = arith.constant 0 : index
    %c2 = arith.constant 2 : index
    %c0_14 = arith.constant 0 : index
    %12 = vector.load %arg1[%c0_13, %c2, %c0_14] : memref<1x18x128xf32, #tpu.memory_space<vmem>>, vector<1x16x128xf32>
    %13 = vector.shape_cast %12 : vector<1x16x128xf32> to vector<16x128xf32>
    %c2_15 = arith.constant 2 : index
    %c0_16 = arith.constant 0 : index
    %c0_17 = arith.constant 0 : index
    %14 = vector.load %arg2[%c2_15, %c0_16, %c0_17] : memref<3x128x128xf32, #tpu.memory_space<vmem>>, vector<1x128x128xf32>
    %15 = vector.shape_cast %14 : vector<1x128x128xf32> to vector<128x128xf32>
    %cst_18 = arith.constant dense<0.000000e+00> : vector<16x128xf32>
    %16 = tpu.matmul %13, %15, %cst_18 {dimension_numbers = #tpu.dot_dimension_numbers<[1], [0], [0], [1], [0, 0, 1, 1], [], []>} : vector<16x128xf32>, vector<128x128xf32>, vector<16x128xf32> -> vector<16x128xf32>
    %17 = arith.addf %11, %16 : vector<16x128xf32>
    %18 = vector.broadcast %0 : vector<1x128xf32> to vector<16x128xf32>
    %19 = arith.addf %17, %18 : vector<16x128xf32>
    %20 = vector.shape_cast %19 : vector<16x128xf32> to vector<1x16x128xf32>
    %c0_19 = arith.constant 0 : index
    %c0_20 = arith.constant 0 : index
    %c0_21 = arith.constant 0 : index
    %21 = vector.load %arg6[%c0_19, %c0_20, %c0_21] : memref<1x16x128xf32, #tpu.memory_space<vmem>>, vector<1x16x128xf32>
    tpu.vector_store %arg6[%c0_19, %c0_20, %c0_21], %20 {strides = array<i32>} : memref<1x16x128xf32, #tpu.memory_space<vmem>>, vector<1x16x128xf32>,
    %cst_22 = arith.constant dense<0.000000e+00> : vector<128xf32>
    %22 = vector.multi_reduction <add>, %19, %cst_22 [0] : vector<16x128xf32> to vector<128xf32>
    %23 = vector.shape_cast %22 : vector<128xf32> to vector<1x128xf32>
    %24 = arith.mulf %19, %19 : vector<16x128xf32>
    %cst_23 = arith.constant dense<0.000000e+00> : vector<128xf32>
    %25 = vector.multi_reduction <add>, %24, %cst_23 [0] : vector<16x128xf32> to vector<128xf32>
    %26 = vector.shape_cast %25 : vector<128xf32> to vector<1x128xf32>
    %c0_24 = arith.constant 0 : index
    %c1_25 = arith.constant 1 : index
    %c0_26 = arith.constant 0 : index
    %27 = vector.load %arg1[%c0_24, %c1_25, %c0_26] : memref<1x18x128xf32, #tpu.memory_space<vmem>>, vector<1x16x128xf32>
    %28 = vector.shape_cast %27 : vector<1x16x128xf32> to vector<16x128xf32>
    %c0_27 = arith.constant 0 : index
    %c0_28 = arith.constant 0 : index
    %29 = vector.load %arg4[%c0_27, %c0_28] : memref<128x128xf32, #tpu.memory_space<vmem>>, vector<128x128xf32>
    %cst_29 = arith.constant dense<0.000000e+00> : vector<16x128xf32>
    %30 = tpu.matmul %28, %29, %cst_29 {dimension_numbers = #tpu.dot_dimension_numbers<[1], [0], [0], [1], [0, 0, 1, 1], [], []>} : vector<16x128xf32>, vector<128x128xf32>, vector<16x128xf32> -> vector<16x128xf32>
    %c0_30 = arith.constant 0 : index
    %c0_31 = arith.constant 0 : index
    %31 = vector.load %arg5[%c0_30, %c0_31] : memref<1x128xf32, #tpu.memory_space<vmem>>, vector<1x128xf32>
    %32 = vector.broadcast %31 : vector<1x128xf32> to vector<16x128xf32>
    %33 = arith.addf %30, %32 : vector<16x128xf32>
    %34 = vector.shape_cast %33 : vector<16x128xf32> to vector<1x16x128xf32>
    %c0_32 = arith.constant 0 : index
    %c0_33 = arith.constant 0 : index
    %c0_34 = arith.constant 0 : index
    %35 = vector.load %arg7[%c0_32, %c0_33, %c0_34] : memref<1x16x128xf32, #tpu.memory_space<vmem>>, vector<1x16x128xf32>
    tpu.vector_store %arg7[%c0_32, %c0_33, %c0_34], %34 {strides = array<i32>} : memref<1x16x128xf32, #tpu.memory_space<vmem>>, vector<1x16x128xf32>,
    %cst_35 = arith.constant dense<0.000000e+00> : vector<128xf32>
    %36 = vector.multi_reduction <add>, %33, %cst_35 [0] : vector<16x128xf32> to vector<128xf32>
    %37 = vector.shape_cast %36 : vector<128xf32> to vector<1x128xf32>
    %38 = arith.mulf %33, %33 : vector<16x128xf32>
    %cst_36 = arith.constant dense<0.000000e+00> : vector<128xf32>
    %39 = vector.multi_reduction <add>, %38, %cst_36 [0] : vector<16x128xf32> to vector<128xf32>
    %40 = vector.shape_cast %39 : vector<128xf32> to vector<1x128xf32>
    %41 = tpu.concatenate %23, %26, %37, %40 in 0 : vector<1x128xf32>, vector<1x128xf32>, vector<1x128xf32>, vector<1x128xf32> -> vector<4x128xf32>
    %c0_37 = arith.constant 0 : index
    %c0_38 = arith.constant 0 : index
    %c0_39 = arith.constant 0 : index
    %42 = vector.load %arg8[%c0_37, %c0_38, %c0_39] : memref<1x4x128xf32, #tpu.memory_space<vmem>>, vector<1x4x128xf32>
    %43 = vector.shape_cast %42 : vector<1x4x128xf32> to vector<4x128xf32>
    %44 = vector.shape_cast %41 : vector<4x128xf32> to vector<1x4x128xf32>
    tpu.vector_store %arg8[%c0_37, %c0_38, %c0_39], %44 {strides = array<i32>} : memref<1x4x128xf32, #tpu.memory_space<vmem>>, vector<1x4x128xf32>,
    return
  }
  func.func @transform_0(%arg0: i32) -> (i32, i32, i32) {
    %c0_i32 = arith.constant 0 : i32
    %c0_i32_0 = arith.constant 0 : i32
    %c0_i32_1 = arith.constant 0 : i32
    return %arg0, %c0_i32, %c0_i32_0 : i32, i32, i32
  }
  func.func @transform_1(%arg0: i32) -> (i32, i32, i32) {
    %c0_i32 = arith.constant 0 : i32
    %c0_i32_0 = arith.constant 0 : i32
    %c0_i32_1 = arith.constant 0 : i32
    %c0_i32_2 = arith.constant 0 : i32
    return %c0_i32, %c0_i32_0, %c0_i32_1 : i32, i32, i32
  }
  func.func @transform_2(%arg0: i32) -> (i32, i32) {
    %c0_i32 = arith.constant 0 : i32
    %c0_i32_0 = arith.constant 0 : i32
    %c0_i32_1 = arith.constant 0 : i32
    return %c0_i32, %c0_i32_0 : i32, i32
  }
  func.func @transform_3(%arg0: i32) -> (i32, i32) {
    %c0_i32 = arith.constant 0 : i32
    %c0_i32_0 = arith.constant 0 : i32
    %c0_i32_1 = arith.constant 0 : i32
    return %c0_i32, %c0_i32_0 : i32, i32
  }
  func.func @transform_4(%arg0: i32) -> (i32, i32) {
    %c0_i32 = arith.constant 0 : i32
    %c0_i32_0 = arith.constant 0 : i32
    %c0_i32_1 = arith.constant 0 : i32
    return %c0_i32, %c0_i32_0 : i32, i32
  }
  func.func @transform_5(%arg0: i32) -> (i32, i32, i32) {
    %c0_i32 = arith.constant 0 : i32
    %c0_i32_0 = arith.constant 0 : i32
    %c0_i32_1 = arith.constant 0 : i32
    return %arg0, %c0_i32, %c0_i32_0 : i32, i32, i32
  }
  func.func @transform_6(%arg0: i32) -> (i32, i32, i32) {
    %c0_i32 = arith.constant 0 : i32
    %c0_i32_0 = arith.constant 0 : i32
    %c0_i32_1 = arith.constant 0 : i32
    return %arg0, %c0_i32, %c0_i32_0 : i32, i32, i32
  }
  func.func @transform_7(%arg0: i32) -> (i32, i32, i32) {
    %c0_i32 = arith.constant 0 : i32
    %c0_i32_0 = arith.constant 0 : i32
    %c0_i32_1 = arith.constant 0 : i32
    return %arg0, %c0_i32, %c0_i32_0 : i32, i32, i32
  }
}

</mosaic_0001>

<bundles_post_ra>
// kernel: tpu_custom_call.1
= control target key start
LH: loop header
LB: loop body
LE: loop exit
PB: predicated region body
PF: predicated region fallthrough
CT: control target
= control target key end

     0   :  { %s1921_s0 = inlined_call_operand.vmem [shape: f32[2,18,128], index: 0, kind: input, shape index: {}]   ;;  %s1922_s1 = inlined_call_operand.hbm [shape: f32[3,128,128], index: 1, kind: input, shape index: {}]   ;;  %s1923_s2 = inlined_call_operand.vmem [shape: f32[1,128], index: 2, kind: input, shape index: {}]   ;;  %s1924_s3 = inlined_call_operand.hbm [shape: f32[128,128], index: 3, kind: input, shape index: {}]   ;;  %s1925_s4 = inlined_call_operand.vmem [shape: f32[1,128], index: 4, kind: input, shape index: {}]   ;;  %s1926_s5 = inlined_call_operand.hbm [shape: f32[2,16,128], index: 5, kind: output, shape index: {0}]   ;;  %s1927_s6 = inlined_call_operand.hbm [shape: f32[2,16,128], index: 6, kind: output, shape index: {1}]   ;;  %s1928_s7 = inlined_call_operand.hbm [shape: f32[2,4,128], index: 7, kind: output, shape index: {2}]  }
   0x1   :  { %1933 = sst [smem:[#allocation16_spill]] %s1921_s0 }
   0x2   :  { %13 = vsyncpa [#allocation3], 0 }
   0x3   :  { %14 = vsyncpa [#allocation6], 0 }
   0x4   :  { %15 = vsyncpa [#allocation4], 0 }
   0x5   :  { %17 = vsyncpa [#allocation4 + $0x1], 0 }
   0x6   :  { %18 = vsyncpa [#allocation9], 0 }
   0x7   :  { %20 = vsyncpa [#allocation9 + $0x1], 0  ;;  %s1640_s24 = smov 0   ;;  %s1642_s25 = smov 0  }
   0x8   :  { %s1644_s26 = smov 0   ;;  %s1646_s27 = smov 0  }
   0x9 LB: > { %s1661_s28 = sadd.s32 4294967295, %s1589_s27   ;;  %s1932_s29 = sadd.s32 4294967294, %s1589_s27   ;;  %s1589_s27 = sphi %s1646_s27, %s1952_s27   ;;  %s1585_s26 = sphi %s1644_s26, %s1951_s26   ;;  %s1581_s25 = sphi %s1642_s25, %s1950_s25   ;;  %s1577_s24 = sphi %s1640_s24, %s1949_s24  }
   0xa   : > { %s1665_s30 = sadd.s32 1, %s1589_s27   ;;  %s143_s8 = sadd.s32 1, %s1585_s26 }
   0xb   : > { %s140_s9 = ssub.s32 %s1589_s27, %s1665_s30  ;;  %p153_p0 = scmp.ne.s32.totalorder %s1585_s26, %s1581_s25 }
   0xc   : > { %p141_p1 = scmp.eq.s32.totalorder %s140_s9, 0  ;;  %p154_p2 = scmp.eq.s32.totalorder %s1661_s28, 1 }
   0xd   : > { %p159_p3 = scmp.ne.s32.totalorder %s1581_s25, %s1577_s24  ;;  %p160_p4 = scmp.eq.s32.totalorder %s1932_s29, 1 }
   0xe   : > { %s1678_s10 = scalar_select %p141_p1, %s1585_s26, %s143_s8  }
   0xf   : > { %p1680_p5 = por %p154_p2, %p153_p0  ;;  %p1684_p6 = por %p160_p4, %p159_p3 }
  0x10   : > { %1934 = sst [smem:[#allocation15_spill]] %s1678_s10  ;;  %p959_p7 = scmp.ge.s32.totalorder %s1589_s27, 1 }
  0x11   : > { %s1935_s11 = scalar_select %p1680_p5, 1, 0 }
  0x12   : > { %s1936_s12 = scalar_select %p1684_p6, 1, 0 }
  0x13   : > { %p219_p8 = scmp.lt.s32.totalorder %s1589_s27, 3  ;;  %p1929_p9 = scmp.eq.s32.totalorder %s1661_s28, 0 }
  0x14   : > { %s1591_s14 = smov [#allocation2]   ;;  %s1592_s17 = smov [#allocation5]  }
  0x15   : > { %p1691_p10 = pnand %p959_p7, %p219_p8  ;;  %s231_s15 = sshll.u32 %s1591_s14, 4  ;;  %s232_s15 = int_to_ptr.vmem [resolvable:$true] %s231_s15 }
  0x16   : > { %s247_s18 = sshll.u32 %s1592_s17, 4  ;;  %s1403_s21 = scalar_lea.hbm %s1922_s1, 6144  ;;  %s1703_s18 = int_to_ptr.vmem [resolvable:$true] %s247_s18 }
  0x17   : > { %s1937_s13 = scalar_select %p1691_p10, 1, 0 }
  0x18   : > { %p1343_p11 = pneg %p1691_p10  ;;  %p1404_p13 = scmp.ne.s32.totalorder %s1922_s1, %s1403_s21 }
  0x19   : > { %p1410_p3 = scmp.lt.u32.totalorder %s1403_s21, %s1922_s1 }
  0x1a   : > { %p1699_p12 = pnand %p1929_p9, %p1343_p11 }
  0x1c   : > { %p1405_p0 = pneg %p1699_p12 }
  0x1e   : > { %p1406_p1 = pnand %p1405_p0, %p1404_p13 }
  0x20   : > { %p1407_p2 = pneg %p1406_p1 }
  0x22   : > { %p1412_p4 = pnand %p1410_p3, %p1407_p2 }
  0x24   : > { %1415 = shalt.err (!%p1412_p4)
}
  0x25   : > { %s1416_s14 = scalar_lea.vmem %s232_s15, 6144  ;;  %p1424_p9 = scmp.lt.s32.totalorder %s232_s15, %s232_s15 }
  0x26   : > { %p1417_p7 = scmp.ne.s32.totalorder %s232_s15, %s1416_s14  ;;  %p1425_p6 = scmp.lt.s32.totalorder %s1416_s14, %s1416_s14 }
  0x28   : > { %p1419_p8 = pnand %p1417_p7, %p1405_p0  ;;  %p1426_p5 = por %p1425_p6, %p1424_p9 }
  0x2a   : > { %p1420_p11 = pneg %p1419_p8 }
  0x2c   : > { %p1427_p10 = pnand %p1426_p5, %p1420_p11 }
  0x2e   : > { %1430 = shalt.err (!%p1427_p10)
}
  0x2f   : > { %s1593_s17 = smov 128   ;;  %s1594_s19 = smov 8  }
  0x30   : > { %1346 = dma.hbm_to_vmem [thread:$0]  (!%p1699_p12), %s1922_s1, 6144, %s232_s15, [#allocation3], %s1593_s17, %s1593_s17, %s1594_s19  }
  0x31   : > { %s1431_s8 = scalar_lea.hbm %s1924_s3, 2048 }
  0x32   : > { %p1432_p13 = scmp.ne.s32.totalorder %s1924_s3, %s1431_s8  ;;  %p1438_p9 = scmp.lt.u32.totalorder %s1431_s8, %s1924_s3 }
  0x34   : > { %p1434_p5 = pnand %p1432_p13, %p1405_p0 }
  0x36   : > { %p1435_p6 = pneg %p1434_p5 }
  0x38   : > { %p1440_p10 = pnand %p1438_p9, %p1435_p6 }
  0x3a   : > { %1443 = shalt.err (!%p1440_p10)
}
  0x3b   : > { %s1444_s15 = scalar_lea.vmem %s1703_s18, 2048  ;;  %p1452_p4 = scmp.lt.s32.totalorder %s1703_s18, %s1703_s18 }
  0x3c   : > { %p1445_p1 = scmp.ne.s32.totalorder %s1703_s18, %s1444_s15  ;;  %p1453_p7 = scmp.lt.s32.totalorder %s1444_s15, %s1444_s15 }
  0x3e   : > { %p1447_p2 = pnand %p1445_p1, %p1405_p0  ;;  %p1454_p8 = por %p1453_p7, %p1452_p4 }
  0x40   : > { %p1448_p3 = pneg %p1447_p2 }
  0x42   : > { %p1455_p11 = pnand %p1454_p8, %p1448_p3 }
  0x44   : > { %1458 = shalt.err (!%p1455_p11)
}
  0x45   : > { %1349 = dma.hbm_to_vmem [thread:$0]  (!%p1699_p12), %s1924_s3, 2048, %s1703_s18, [#allocation6], %s1593_s17, %s1593_s17, %s1594_s19  }
  0x46   : > { %p1939_p13 = scmp.ne.s32.totalorder %s1937_s13, 0 }
  0x47   : > { %p1940_p5 = scmp.eq.s32.totalorder (!%p1939_p13), %s1661_s28, 0 }
  0x48   : > { %274 = sbr.rel (%p1939_p13) target bundleno = 435 (0x1b3), region = 40 }
  0x4f   : > { %1560 = dma.done.wait (%p1940_p5), [#allocation3], 6144   ;;  %p1941_p0 = pmov %p1940_p5 }
  0x51   : > { %1562 = vsyncadd (%p1941_p0), [#allocation3], 4294961152  ;;  %p1942_p6 = pmov %p1941_p0 }
  0x52   : > { %p1943_p9 = pmov %p1941_p0 }
  0x53   : > { %1564 = dma.done.wait (%p1942_p6), [#allocation6], 2048  }
  0x54   : > { %1566 = vsyncadd (%p1943_p9), [#allocation6], 4294965248  ;;  %p320_p10 = scmp.lt.s32.totalorder %s1661_s28, 1  ;;  %v347_v0 = vld [vmem:[#allocation2 + $0x80] sm:$0xff]  ;;  %v348_v1 = vld [vmem:[#allocation2 + $0x88] sm:$0xff]  ;;  %s1944_s0 = sld [smem:[#allocation16_spill]] }
  0x55   : > { %v328_v2 = vld [vmem:[#allocation2] sm:$0xff]  ;;  %v1196_v3 = vpack.c.bf16 %v348_v1, %v347_v0  ;;  %v329_v4 = vld [vmem:[#allocation2 + $0x8] sm:$0xff]  ;;  %v349_v5 = vld [vmem:[#allocation2 + $0x90] sm:$0xff]  ;;  %s1787_s20 = sand.u32 1, %s1581_s25   ;;  %s765_s14 = sand.u32 1, %s1661_s28  }
  0x56   : > { %s1764_s16 = scalar_select %p320_p10, %s1661_s28, 1  ;;  %v350_v6 = vld [vmem:[#allocation2 + $0x98] sm:$0xff]  ;;  %v1228_v7 = vpack.c.bf16 %v329_v4, %v328_v2  ;;  %v330_v9 = vld [vmem:[#allocation2 + $0x10] sm:$0xff]  ;;  %v351_v11 = vld [vmem:[#allocation2 + $0xa0] sm:$0xff] }
  0x57   : > { %v1200_v8 = vpack.c.bf16 %v350_v6, %v349_v5  ;;  %v331_v10 = vld [vmem:[#allocation2 + $0x18] sm:$0xff]  ;;  %1197 = vmatprep.subr.bf16.mxu1 %v1196_v3  ;;  %v352_v13 = vld [vmem:[#allocation2 + $0xa8] sm:$0xff]  ;;  %v332_v14 = vld [vmem:[#allocation2 + $0x20] sm:$0xff]  ;;  %s966_s21 = sshll.u32 %s1787_s20, 4  ;;  %s982_s15 = sshll.u32 %s1661_s28, 8 }
  0x58   : > { %v1232_v12 = vpack.c.bf16 %v331_v10, %v330_v9  ;;  %v333_v15 = vld [vmem:[#allocation2 + $0x28] sm:$0xff]  ;;  %s1328_s13 = smul.u32 24, %s1764_s16  ;;  %1229 = vmatprep.subr.bf16.mxu0 %v1228_v7  ;;  %1199 = vmatpush3.bf16.msra.mxu1 %v1196_v3  ;;  %v1204_v16 = vpack.c.bf16 %v352_v13, %v351_v11  ;;  %v353_v18 = vld [vmem:[#allocation2 + $0xb0] sm:$0xff]  ;;  %v354_v19 = vld [vmem:[#allocation2 + $0xb8] sm:$0xff]  ;;  %s312_s22 = scalar_lea.vmem [#allocation8], %s966_s21 }
  0x59   : > { %1231 = vmatpush3.bf16.msra.mxu0 %v1228_v7  ;;  %1201 = vmatprep.subr.bf16.mxu1 %v1200_v8  ;;  %v1236_v17 = vpack.c.bf16 %v333_v15, %v332_v14  ;;  %v334_v20 = vld [vmem:[#allocation2 + $0x30] sm:$0xff]  ;;  %v335_v21 = vld [vmem:[#allocation2 + $0x38] sm:$0xff]  ;;  %v1208_v22 = vpack.c.bf16 %v354_v19, %v353_v18  ;;  %v355_v24 = vld [vmem:[#allocation2 + $0xc0] sm:$0xff]  ;;  %s800_s23 = sshll.u32 %s312_s22, 4  ;;  %s1795_s29 = scalar_lea.vmem [#allocation7], %s966_s21  ;;  %s1798_s23 = int_to_ptr.vmem [resolvable:$true] %s800_s23 }
  0x5a   : > { %1233 = vmatprep.subr.bf16.mxu0 %v1232_v12  ;;  %s1770_s19 = scalar_lea.vmem %s1944_s0, %s1328_s13  ;;  %v1240_v23 = vpack.c.bf16 %v335_v21, %v334_v20  ;;  %v356_v25 = vld [vmem:[#allocation2 + $0xc8] sm:$0xff]  ;;  %v336_v27 = vld [vmem:[#allocation2 + $0x40] sm:$0xff]  ;;  %v357_v32 = vld [vmem:[#allocation2 + $0xd0] sm:$0xff]  ;;  %s784_s10 = sshll.u32 %s1795_s29, 4  ;;  %s1808_s10 = int_to_ptr.vmem [resolvable:$true] %s784_s10 }
  0x5b   : > { %v1773_v26 = vld [vmem:[%s1770_s19 + $0x1] sm:$0xff]  ;;  %v1212_v30 = vpack.c.bf16 %v356_v25, %v355_v24  ;;  %v358_v33 = vld [vmem:[#allocation2 + $0xd8] sm:$0xff]  ;;  %v338_v34 = vld [vmem:[#allocation2 + $0x50] sm:$0xff]  ;;  %s1813_s9 = scalar_lea.hbm %s1926_s5, %s982_s15  ;;  %s1815_s16 = scalar_lea.sflag [#allocation9], %s765_s14 }
  0x5c   : > { %1203 = vmatpush3.bf16.msra.mxu1 %v1200_v8  ;;  %v337_v28 = vld [vmem:[#allocation2 + $0x48] sm:$0xff]  ;;  %1088 = vmatprep.mubr.f32.mxu1 %v1773_v26  ;;  %v326_v29 = vld [vmem:[%s1770_s19] sm:$0xff]  ;;  %v339_v35 = vld [vmem:[#allocation2 + $0x58] sm:$0xff]  ;;  %v1216_v36 = vpack.c.bf16 %v358_v33, %v357_v32  ;;  %s1459_s13 = scalar_lea.vmem %s1798_s23, 256  ;;  %p1945_p1 = scmp.ne.s32.totalorder %s1935_s11, 0 }
  0x5d   : > { %1235 = vmatpush3.bf16.msra.mxu0 %v1232_v12  ;;  %1205 = vmatprep.subr.bf16.mxu1 %v1204_v16  ;;  %v1244_v31 = vpack.c.bf16 %v337_v28, %v336_v27  ;;  %v1248_v37 = vpack.c.bf16 %v339_v35, %v338_v34  ;;  %v359_v38 = vld [vmem:[#allocation2 + $0xe0] sm:$0xff]  ;;  %v360_v39 = vld [vmem:[#allocation2 + $0xe8] sm:$0xff]  ;;  %v361_v44 = vld [vmem:[#allocation2 + $0xf0] sm:$0xff]  ;;  %p1460_p12 = scmp.ne.s32.totalorder %s1798_s23, %s1459_s13  ;;  %s1595_s18 = smov [#allocation8]  }
  0x5e   : > { %1237 = vmatprep.subr.bf16.mxu0 %v1236_v17  ;;  %1123 = vmatprep.mubr.f32.mxu0 %v326_v29  ;;  %v340_v40 = vld [vmem:[#allocation2 + $0x60] sm:$0xff]  ;;  %v341_v41 = vld [vmem:[#allocation2 + $0x68] sm:$0xff]  ;;  %v1220_v42 = vpack.c.bf16 %v360_v39, %v359_v38  ;;  %v362_v45 = vld [vmem:[#allocation2 + $0xf8] sm:$0xff]  ;;  %s1463_s17 = sshll.u32 %s1595_s18, 4  ;;  %s1464_s17 = int_to_ptr.vmem [resolvable:$false] %s1463_s17 }
  0x5f   : > { %v1252_v43 = vpack.c.bf16 %v341_v41, %v340_v40  ;;  %v342_v46 = vld [vmem:[#allocation2 + $0x70] sm:$0xff]  ;;  %v343_v47 = vld [vmem:[#allocation2 + $0x78] sm:$0xff]  ;;  %v1224_v48 = vpack.c.bf16 %v362_v45, %v361_v44  ;;  %v637_v50 = vld [vmem:[#allocation5] sm:$0xff]  ;;  %p1461_p2 = pnand %p1460_p12, %p1945_p1  ;;  %s1465_s0 = scalar_lea.vmem %s1464_s17, 512 }
  0x60   : > { %1207 = vmatpush3.bf16.msra.mxu1 %v1204_v16  ;;  %v1256_v49 = vpack.c.bf16 %v343_v47, %v342_v46  ;;  %v638_v51 = vld [vmem:[#allocation5 + $0x8] sm:$0xff]  ;;  %v516_v52 = vld [vmem:[#allocation2 + $0x100] sm:$0xff]  ;;  %v639_v56 = vld [vmem:[#allocation5 + $0x10] sm:$0xff]  ;;  %p1466_p4 = scmp.lt.s32.totalorder %s1798_s23, %s1464_s17  ;;  %p1467_p7 = scmp.lt.s32.totalorder %s1465_s0, %s1459_s13 }
  0x61   : > { %1239 = vmatpush3.bf16.msra.mxu0 %v1236_v17  ;;  %1209 = vmatprep.subr.bf16.mxu1 %v1208_v22  ;;  %v517_v53 = vld [vmem:[#allocation2 + $0x108] sm:$0xff]  ;;  %v1292_v54 = vpack.c.bf16 %v638_v51, %v637_v50  ;;  %v640_v57 = vld [vmem:[#allocation5 + $0x18] sm:$0xff]  ;;  %v518_v58 = vld [vmem:[#allocation2 + $0x110] sm:$0xff]  ;;  %p1462_p3 = pneg %p1461_p2 }
  0x62   : > { %1241 = vmatprep.subr.bf16.mxu0 %v1240_v23  ;;  %v1260_v55 = vpack.c.bf16 %v517_v53, %v516_v52  ;;  %v519_v59 = vld [vmem:[#allocation2 + $0x118] sm:$0xff]  ;;  %v1778_v60 = vld [vmem:[%s1770_s19 + $0x9] sm:$0xff]  ;;  %v1296_v62 = vpack.c.bf16 %v640_v57, %v639_v56  ;;  %v641_v0 = vld [vmem:[#allocation5 + $0x20] sm:$0xff]  ;;  %p1468_p8 = por %p1467_p7, %p1466_p4 }
  0x63   : > { %v327_v61 = vld [vmem:[%s1770_s19 + $0x8] sm:$0xff]  ;;  %v1264_v63 = vpack.c.bf16 %v519_v59, %v518_v58  ;;  %v520_v2 = vld [vmem:[#allocation2 + $0x120] sm:$0xff]  ;;  %v643_v7 = vld [vmem:[#allocation5 + $0x30] sm:$0xff] }
  0x64   : > { %1211 = vmatpush3.bf16.msra.mxu1 %v1208_v22  ;;  %v642_v1 = vld [vmem:[#allocation5 + $0x28] sm:$0xff]  ;;  %v644_v8 = vld [vmem:[#allocation5 + $0x38] sm:$0xff]  ;;  %v522_v9 = vld [vmem:[#allocation2 + $0x130] sm:$0xff]  ;;  %p1469_p11 = pnand %p1468_p8, %p1462_p3 }
  0x65   : > { %1243 = vmatpush3.bf16.msra.mxu0 %v1240_v23  ;;  %1213 = vmatprep.subr.bf16.mxu1 %v1212_v30  ;;  %v521_v3 = vld [vmem:[#allocation2 + $0x128] sm:$0xff]  ;;  %v1300_v5 = vpack.c.bf16 %v642_v1, %v641_v0  ;;  %v523_v10 = vld [vmem:[#allocation2 + $0x138] sm:$0xff]  ;;  %v1304_v11 = vpack.c.bf16 %v644_v8, %v643_v7  ;;  %v645_v13 = vld [vmem:[#allocation5 + $0x40] sm:$0xff] }
  0x66   : > { %1245 = vmatprep.subr.bf16.mxu0 %v1244_v31  ;;  %v513_v4 = vld [vmem:[%s1770_s19 + $0x2] sm:$0xff]  ;;  %v1268_v6 = vpack.c.bf16 %v521_v3, %v520_v2  ;;  %v1272_v12 = vpack.c.bf16 %v523_v10, %v522_v9  ;;  %v647_v19 = vld [vmem:[#allocation5 + $0x50] sm:$0xff]  ;;  %v648_v20 = vld [vmem:[#allocation5 + $0x58] sm:$0xff] }
  0x67   : > { %v646_v14 = vld [vmem:[#allocation5 + $0x48] sm:$0xff]  ;;  %v524_v15 = vld [vmem:[#allocation2 + $0x140] sm:$0xff]  ;;  %v526_v21 = vld [vmem:[#allocation2 + $0x150] sm:$0xff]  ;;  %v1312_v23 = vpack.c.bf16 %v648_v20, %v647_v19 }
  0x68   : > { %1215 = vmatpush3.bf16.msra.mxu1 %v1212_v30  ;;  %v525_v16 = vld [vmem:[#allocation2 + $0x148] sm:$0xff]  ;;  %v1308_v17 = vpack.c.bf16 %v646_v14, %v645_v13  ;;  %v527_v22 = vld [vmem:[#allocation2 + $0x158] sm:$0xff]  ;;  %v649_v25 = vld [vmem:[#allocation5 + $0x60] sm:$0xff] }
  0x69   : > { %1247 = vmatpush3.bf16.msra.mxu0 %v1244_v31  ;;  %1217 = vmatprep.subr.bf16.mxu1 %v1216_v36  ;;  %v1276_v18 = vpack.c.bf16 %v525_v16, %v524_v15  ;;  %v1280_v24 = vpack.c.bf16 %v527_v22, %v526_v21  ;;  %v528_v27 = vld [vmem:[#allocation2 + $0x160] sm:$0xff]  ;;  %v529_v28 = vld [vmem:[#allocation2 + $0x168] sm:$0xff]  ;;  %v651_v31 = vld [vmem:[#allocation5 + $0x70] sm:$0xff] }
  0x6a   : > { %1249 = vmatprep.subr.bf16.mxu0 %v1248_v37  ;;  %v1284_v30 = vpack.c.bf16 %v529_v28, %v528_v27  ;;  %v652_v32 = vld [vmem:[#allocation5 + $0x78] sm:$0xff]  ;;  %v530_v33 = vld [vmem:[#allocation2 + $0x170] sm:$0xff]  ;;  %v971_v40 = vld [vmem:[%s1925_s4] ss:$0 sm:$0xff] }
  0x6b   : > { %v531_v34 = vld [vmem:[#allocation2 + $0x178] sm:$0xff]  ;;  %v1320_v35 = vpack.c.bf16 %v652_v32, %v651_v31 }
  0x6c   : > { %1219 = vmatpush3.bf16.msra.mxu1 %v1216_v36  ;;  %v1288_v36 = vpack.c.bf16 %v531_v34, %v530_v33 }
  0x6d   : > { %1251 = vmatpush3.bf16.msra.mxu0 %v1248_v37  ;;  %1221 = vmatprep.subr.bf16.mxu1 %v1220_v42  ;;  %v514_v37 = vld [vmem:[%s1770_s19 + $0xa] sm:$0xff]  ;;  %s1806_s19 = scalar_lea.hbm %s1927_s6, %s982_s15 }
  0x6e   : > { %1253 = vmatprep.subr.bf16.mxu0 %v1252_v43 }
  0x70   : > { %1223 = vmatpush3.bf16.msra.mxu1 %v1220_v42  ;;  %v970_v42 = vld [vmem:[%s1923_s2] ss:$0 sm:$0xff] }
  0x71   : > { %1255 = vmatpush3.bf16.msra.mxu0 %v1252_v43  ;;  %1225 = vmatprep.subr.bf16.mxu1 %v1224_v48 }
  0x72   : > { %1257 = vmatprep.subr.bf16.mxu0 %v1256_v49 }
  0x74   : > { %1227 = vmatpush3.bf16.msra.mxu1 %v1224_v48 }
  0x75   : > { %1259 = vmatpush3.bf16.msra.mxu0 %v1256_v49  ;;  %1293 = vmatprep.subr.bf16.mxu1 %v1292_v54 }
  0x76   : > { %1261 = vmatprep.subr.bf16.mxu0 %v1260_v55 }
  0x77   : > { %1089 = vmatmul.mubr.f32.vlgmr.msra.gmra.mrb[0].mxu1 %v1778_v60 }
  0x78   : > { %1124 = vmatmul.mubr.f32.vlgmr.msra.gmra.mrb[0].mxu0 %v327_v61  ;;  %1295 = vmatpush3.bf16.msra.mxu1 %v1292_v54 }
  0x79   : > { %1263 = vmatpush3.bf16.msra.mxu0 %v1260_v55  ;;  %1297 = vmatprep.subr.bf16.mxu1 %v1296_v62 }
  0x7a   : > { %1265 = vmatprep.subr.bf16.mxu0 %v1264_v63  ;;  %1158 = vmatprep.mubr.f32.mxu0 %v513_v4 }
  0x7b   : > { %1193 = vmatprep.mubr.f32.mxu1 %v1773_v26  ;;  %v650_v26 = vld [vmem:[#allocation5 + $0x68] sm:$0xff] }
  0x7c   : > { %1299 = vmatpush3.bf16.msra.mxu1 %v1296_v62  ;;  %v1316_v29 = vpack.c.bf16 %v650_v26, %v649_v25 }
  0x7d   : > { %1267 = vmatpush3.bf16.msra.mxu0 %v1264_v63  ;;  %1301 = vmatprep.subr.bf16.mxu1 %v1300_v5 }
  0x7e   : > { %1269 = vmatprep.subr.bf16.mxu0 %v1268_v6 }
  0x80   : > { %1303 = vmatpush3.bf16.msra.mxu1 %v1300_v5 }
  0x81   : > { %1271 = vmatpush3.bf16.msra.mxu0 %v1268_v6  ;;  %1305 = vmatprep.subr.bf16.mxu1 %v1304_v11 }
  0x82   : > { %1273 = vmatprep.subr.bf16.mxu0 %v1272_v12 }
  0x84   : > { %1307 = vmatpush3.bf16.msra.mxu1 %v1304_v11 }
  0x85   : > { %1275 = vmatpush3.bf16.msra.mxu0 %v1272_v12  ;;  %1309 = vmatprep.subr.bf16.mxu1 %v1308_v17 }
  0x86   : > { %1277 = vmatprep.subr.bf16.mxu0 %v1276_v18 }
  0x88   : > { %1311 = vmatpush3.bf16.msra.mxu1 %v1308_v17 }
  0x89   : > { %1279 = vmatpush3.bf16.msra.mxu0 %v1276_v18  ;;  %1313 = vmatprep.subr.bf16.mxu1 %v1312_v23 }
  0x8a   : > { %1281 = vmatprep.subr.bf16.mxu0 %v1280_v24 }
  0x8c   : > { %1315 = vmatpush3.bf16.msra.mxu1 %v1312_v23 }
  0x8d   : > { %1283 = vmatpush3.bf16.msra.mxu0 %v1280_v24  ;;  %1317 = vmatprep.subr.bf16.mxu1 %v1316_v29 }
  0x8e   : > { %1285 = vmatprep.subr.bf16.mxu0 %v1284_v30 }
  0x90   : > { %1319 = vmatpush3.bf16.msra.mxu1 %v1316_v29 }
  0x91   : > { %1287 = vmatpush3.bf16.msra.mxu0 %v1284_v30  ;;  %1321 = vmatprep.subr.bf16.mxu1 %v1320_v35 }
  0x92   : > { %1289 = vmatprep.subr.bf16.mxu0 %v1288_v36 }
  0x94   : > { %1323 = vmatpush3.bf16.msra.mxu1 %v1320_v35 }
  0x95   : > { %1291 = vmatpush3.bf16.msra.mxu0 %v1288_v36 }
  0x97   : > { %1194 = vmatmul.mubr.f32.vlgmr.msra.gmra.mrb[2].mxu1 %v1778_v60 }
  0x98   : > { %1159 = vmatmul.mubr.f32.vlgmr.msra.gmra.mrb[0].mxu0 %v514_v37 }
 0x14a   : > { %v1090_v38 = vpop.f32.mrb[0].mxu1 }
 0x14b   : > { %v429_v39 = vpop.f32.mrb[1].mxu1 }
 0x16a   : > { %v1195_v41 = vpop.f32.mrb[2].mxu1 }
 0x16b   : > { %v1160_v43 = vpop.f32.mrb[0].mxu0  ;;  %v732_v44 = vadd.f32 %v1195_v41, %v971_v40  ;;  %v726_v45 = vpop.f32.mrb[3].mxu1 }
 0x16c   : > { %v1324_v46 = vadd.f32 %v1160_v43, %v1090_v38  ;;  %v598_v47 = vpop.f32.mrb[1].mxu0  ;;  %v727_v48 = vadd.f32 %v971_v40, %v726_v45 }
 0x16d   : > { %736 = vst [vmem:[%s312_s22 + $0x8] sm:$0xff] %v732_v44  ;;  %v745_v49 = vmul.f32 %v732_v44, %v732_v44  ;;  %v1325_v50 = vadd.f32 %v598_v47, %v429_v39 }
 0x16e   : > { %v616_v51 = vadd.f32 %v1324_v46, %v970_v42  ;;  %735 = vst [vmem:[%s312_s22] sm:$0xff] %v727_v48  ;;  %v737_v52 = vadd.f32 %v732_v44, %v727_v48  ;;  %v744_v53 = vmul.f32 %v727_v48, %v727_v48 }
 0x16f   : > { %v615_v54 = vadd.f32 %v1325_v50, %v970_v42 }
 0x170   : > { %1472 = shalt.err (!%p1469_p11)
}
 0x171   : > { %s1473_s22 = scalar_lea.hbm %s1806_s19, 256  ;;  %s1477_s21 = scalar_lea.hbm %s1927_s6, 512 }
 0x172   : > { %p1474_p13 = scmp.ne.s32.totalorder %s1806_s19, %s1473_s22  ;;  %p1478_p6 = scmp.lt.u32.totalorder %s1806_s19, %s1927_s6 }
 0x173   : > { %p1479_p9 = scmp.lt.u32.totalorder %s1477_s21, %s1473_s22  ;;  %p1481_p12 = scmp.lt.u32.totalorder %s1473_s22, %s1806_s19 }
 0x174   : > { %p1475_p5 = pnand %p1474_p13, %p1945_p1 }
 0x175   : > { %p1480_p10 = por %p1479_p9, %p1478_p6 }
 0x176   : > { %p1476_p0 = pneg %p1475_p5 }
 0x177   : > { %p1482_p2 = por %p1481_p12, %p1480_p10 }
 0x179   : > { %p1483_p3 = pnand %p1482_p2, %p1476_p0 }
 0x17b   : > { %1486 = shalt.err (!%p1483_p3)
}
 0x17c   : > { %s1596_s0 = smov 128   ;;  %s1597_s13 = smov 8   ;;  %618 = vst [vmem:[%s1795_s29 + $0x8] sm:$0xff] %v616_v51  ;;  %v627_v55 = vmul.f32 %v616_v51, %v616_v51  ;;  %v738_v56 = vrot.slane %v737_v52, 4  ;;  %v746_v57 = vadd.f32 %v745_v49, %v744_v53  ;;  %617 = vst [vmem:[%s1795_s29] sm:$0xff] %v615_v54  ;;  %v619_v58 = vadd.f32 %v616_v51, %v615_v54 }
 0x17d   : > { %1338 = dma.vmem_to_hbm [thread:$0]  (%p1945_p1), %s1798_s23, 256, %s1806_s19, %s1815_s16, %s1596_s0, %s1596_s0, %s1597_s13   ;;  %v626_v59 = vmul.f32 %v615_v54, %v615_v54 }
 0x17e   : > { %v739_v60 = vadd.f32 %v738_v56, %v737_v52  ;;  %v747_v61 = vrot.slane %v746_v57, 4  ;;  %s761_s17 = scalar_lea.sflag [#allocation4], %s1787_s20  ;;  %s1487_s22 = scalar_lea.vmem %s1808_s10, 256 }
 0x17f   : > { %p1488_p4 = scmp.ne.s32.totalorder %s1808_s10, %s1487_s22  ;;  %s1598_s14 = smov [#allocation7]  }
 0x180   : > { %s1491_s15 = sshll.u32 %s1598_s14, 4  ;;  %s1492_s15 = int_to_ptr.vmem [resolvable:$false] %s1491_s15 }
 0x181   : > { %p1489_p7 = pnand %p1488_p4, %p1945_p1  ;;  %s1493_s23 = scalar_lea.vmem %s1492_s15, 512 }
 0x182   : > { %p1494_p11 = scmp.lt.s32.totalorder %s1808_s10, %s1492_s15  ;;  %p1495_p13 = scmp.lt.s32.totalorder %s1493_s23, %s1487_s22 }
 0x183   : > { %p1490_p8 = pneg %p1489_p7 }
 0x184   : > { %p1496_p5 = por %p1495_p13, %p1494_p11 }
 0x186   : > { %p1497_p0 = pnand %p1496_p5, %p1490_p8 }
 0x188   : > { %1500 = shalt.err (!%p1497_p0)
}
 0x189   : > { %s1501_s29 = scalar_lea.hbm %s1813_s9, 256  ;;  %s1505_s8 = scalar_lea.hbm %s1926_s5, 512 }
 0x18a   : > { %p1502_p6 = scmp.ne.s32.totalorder %s1813_s9, %s1501_s29  ;;  %p1506_p12 = scmp.lt.u32.totalorder %s1813_s9, %s1926_s5 }
 0x18b   : > { %p1507_p2 = scmp.lt.u32.totalorder %s1505_s8, %s1501_s29  ;;  %p1509_p4 = scmp.lt.u32.totalorder %s1501_s29, %s1813_s9 }
 0x18c   : > { %p1503_p9 = pnand %p1502_p6, %p1945_p1 }
 0x18d   : > { %p1508_p3 = por %p1507_p2, %p1506_p12 }
 0x18e   : > { %p1504_p10 = pneg %p1503_p9 }
 0x18f   : > { %p1510_p7 = por %p1509_p4, %p1508_p3 }
 0x191   : > { %p1511_p8 = pnand %p1510_p7, %p1504_p10 }
 0x193   : > { %1514 = shalt.err (!%p1511_p8)
}
 0x194   : > { %1337 = dma.vmem_to_hbm [thread:$0]  (%p1945_p1), %s1808_s10, 256, %s1813_s9, %s761_s17, %s1596_s0, %s1596_s0, %s1597_s13   ;;  %v620_v62 = vrot.slane %v619_v58, 4  ;;  %v628_v63 = vadd.f32 %v627_v55, %v626_v59  ;;  %v740_v0 = vrot.slane %v739_v60, 2  ;;  %v748_v1 = vadd.f32 %v747_v61, %v746_v57 }
 0x195   : > { %s968_s22 = sshll.u32 %s1787_s20, 2  ;;  %vm753_vm0 = vcmask 1040384   ;;  %vm755_vm1 = vcmask 1041408   ;;  %s979_s10 = sshll.u32 %s1661_s28, 6  ;;  %vm757_vm2 = vcmask 1042432  }
 0x196   : > { %v621_v2 = vadd.f32 %v620_v62, %v619_v58  ;;  %v629_v3 = vrot.slane %v628_v63, 4  ;;  %v749_v4 = vrot.slane %v748_v1, 2  ;;  %v741_v7 = vadd.f32 %v740_v0, %v739_v60  ;;  %s319_s9 = scalar_lea.vmem [#allocation10], %s968_s22  ;;  %s1876_s17 = scalar_lea.hbm %s1928_s7, %s979_s10 }
 0x197   : > { %s816_s0 = sshll.u32 %s319_s9, 4  ;;  %s1599_s15 = smov [#allocation10]   ;;  %s1878_s0 = int_to_ptr.vmem [resolvable:$true] %s816_s0 }
 0x198   : > { %v622_v5 = vrot.slane %v621_v2, 2  ;;  %v630_v6 = vadd.f32 %v629_v3, %v628_v63  ;;  %v750_v10 = vadd.f32 %v749_v4, %v748_v1  ;;  %v742_v13 = vrot.slane %v741_v7, 1  ;;  %s1515_s28 = scalar_lea.vmem %s1878_s0, 64  ;;  %s1519_s23 = sshll.u32 %s1599_s15, 4  ;;  %s1520_s23 = int_to_ptr.vmem [resolvable:$false] %s1519_s23 }
 0x199   : > { %p1516_p11 = scmp.ne.s32.totalorder %s1878_s0, %s1515_s28  ;;  %s1521_s29 = scalar_lea.vmem %s1520_s23, 128 }
 0x19a   : > { %v623_v8 = vadd.f32 %v622_v5, %v621_v2  ;;  %v631_v9 = vrot.slane %v630_v6, 2  ;;  %v751_v15 = vrot.slane %v750_v10, 1  ;;  %v743_v18 = vadd.f32 %v742_v13, %v741_v7  ;;  %p1522_p0 = scmp.lt.s32.totalorder %s1878_s0, %s1520_s23  ;;  %p1523_p6 = scmp.lt.s32.totalorder %s1521_s29, %s1515_s28 }
 0x19b   : > { %p1517_p13 = pnand %p1516_p11, %p1945_p1 }
 0x19c   : > { %v624_v11 = vrot.slane %v623_v8, 1  ;;  %v632_v12 = vadd.f32 %v631_v9, %v630_v6  ;;  %v752_v19 = vadd.f32 %v751_v15, %v750_v10  ;;  %p1524_p9 = por %p1523_p6, %p1522_p0 }
 0x19d   : > { %p1518_p5 = pneg %p1517_p13 }
 0x19e   : > { %v633_v14 = vrot.slane %v632_v12, 1  ;;  %v625_v16 = vadd.f32 %v624_v11, %v623_v8 }
 0x19f   : > { %p1525_p10 = pnand %p1524_p9, %p1518_p5 }
 0x1a0   : > { %v634_v17 = vadd.f32 %v633_v14, %v632_v12 }
 0x1a2   : > { %v754_v20 = vsel %vm753_vm0, %v625_v16, %v634_v17 }
 0x1a3   : > { %v756_v21 = vsel %vm755_vm1, %v754_v20, %v743_v18 }
 0x1a4   : > { %v758_v22 = vsel %vm757_vm2, %v756_v21, %v752_v19 }
 0x1a5   : > { %759 = vst [vmem:[%s319_s9] sm:$0xf] %v758_v22 }
 0x1a6   : > { %1528 = shalt.err (!%p1525_p10)
}
 0x1a7   : > { %s1529_s19 = scalar_lea.hbm %s1876_s17, 64  ;;  %s1533_s18 = scalar_lea.hbm %s1928_s7, 128 }
 0x1a8   : > { %p1530_p12 = scmp.ne.s32.totalorder %s1876_s17, %s1529_s19  ;;  %p1534_p4 = scmp.lt.u32.totalorder %s1876_s17, %s1928_s7 }
 0x1a9   : > { %p1535_p7 = scmp.lt.u32.totalorder %s1533_s18, %s1529_s19  ;;  %p1537_p11 = scmp.lt.u32.totalorder %s1529_s19, %s1876_s17 }
 0x1aa   : > { %p1531_p2 = pnand %p1530_p12, %p1945_p1 }
 0x1ab   : > { %p1536_p8 = por %p1535_p7, %p1534_p4 }
 0x1ac   : > { %p1532_p3 = pneg %p1531_p2 }
 0x1ad   : > { %p1538_p13 = por %p1537_p11, %p1536_p8 }
 0x1af   : > { %p1539_p5 = pnand %p1538_p13, %p1532_p3 }
 0x1b1   : > { %1542 = shalt.err (!%p1539_p5)
}
 0x1b2   : > { %1339 = dma.vmem_to_hbm [thread:$0]  (%p1945_p1), %s1878_s0, 64, %s1876_s17, %s1815_s16  }
 0x1b3 PF: > { %p1364_p0 = scmp.ge.s32.totalorder %s1589_s27, 2  ;;  %s828_s10 = sand.u32 1, %s1577_s24  }
 0x1b4   : > { %p1946_p6 = scmp.ne.s32.totalorder %s1936_s12, 0  ;;  %s829_s9 = scalar_lea.sflag [#allocation4], %s828_s10 }
 0x1b6   : > { %p1351_p9 = pnand %p1364_p0, %p1946_p6 }
 0x1b8   : > { %1568 = dma.done.wait (!%p1351_p9), %s829_s9, 256  }
 0x1b9   : > { %1570 = vsyncadd (!%p1351_p9), %s829_s9, 4294967040  ;;  %s1947_s13 = sadd.s32 4294967294, %s1589_s27  }
 0x1ba   : > { %s837_s20 = sand.u32 1, %s1947_s13  }
 0x1bb   : > { %s838_s28 = scalar_lea.sflag [#allocation9], %s837_s20 }
 0x1bc   : > { %1572 = dma.done.wait (!%p1351_p9), %s838_s28, 320  }
 0x1bd   : > { %1574 = vsyncadd (!%p1351_p9), %s838_s28, 4294966976  ;;  %s1948_s11 = sld [smem:[#allocation15_spill]]  ;;  %p23_p1 = scmp.ge.s32.totalorder %s1665_s30, 4  }
 0x1be   : > { %s1949_s24 = smov %s1581_s25  ;;  %s1950_s25 = smov %s1585_s26 }
 0x1bf   : > { %s1952_s27 = smov %s1665_s30  ;;  %25 = sbr.rel (!%p23_p1) target bundleno = 9 (0x9), region = 118 }
 0x1c3   : > { %s1951_s26 = smov %s1948_s11 }
 0x1c6   :  { %852 = vsyncpa [#allocation3], 1 }
 0x1c7   :  { %854 = vsyncpa [#allocation3 + $0x1], 1 }
 0x1c8   :  { %855 = vsyncpa [#allocation6], 1 }
 0x1c9   :  { %856 = vsyncpa [#allocation4], 1 }
 0x1ca   :  { %858 = vsyncpa [#allocation4 + $0x1], 1 }
 0x1cb   :  { %859 = vsyncpa [#allocation9], 1 }
 0x1cc   :  { %861 = vsyncpa [#allocation9 + $0x1], 1 }

</bundles_post_ra>
